<compile_context>
chip_gen: v5e
topology: v5e:2x2
jax: 0.10.0
libtpu: 0.0.40
codegen_flags: <defaults>
</compile_context>

<pallas_src>
import functools

import jax
import jax.numpy as jnp
from jax.experimental import pallas as pl
from jax.experimental.pallas import tpu as pltpu


# ----------------------------------------------------------------------------- helpers

def _round_up(x, m):
    return ((x + m - 1) // m) * m


def _dual_tensorcore():
    """True on chips whose TensorCores are fed by sharding a 'parallel' grid axis."""
    try:
        kind = jax.devices()[0].device_kind.lower()
    except Exception:
        return False
    return ('v4' in kind) or ('v5p' in kind) or ('v7' in kind)


def _pick_batch_tile(batch, n_pad, dual_core):
    """batch_tile (divisor of batch) for the fused block kernel.

    Single-TC chips (v5e/v6e): grid steps are a serial loop -> maximize M (grid may be 1).
    Dual-TC chips: keep >=2 parallel row tiles only if each tile still has M >= 256.
    """
    divs = [d for d in range(1, batch + 1) if batch % d == 0]
    fits = [d for d in divs if d * n_pad <= 1024] or [min(divs)]
    if dual_core:
        two_step = [d for d in fits if batch // d >= 2]
        if two_step and max(two_step) * n_pad >= 256:
            return max(two_step)
    return max(fits)


def _patchify(x, p):
    """(B, 3, H, W) -> (B, nh*nw, 3*p*p) in (c, ky, kx) order (== Conv2d stride=p)."""
    b, c, hh, ww = x.shape
    nh, nw = hh // p, ww // p
    x = x.reshape(b, c, nh, p, nw, p)
    x = x.transpose(0, 2, 4, 1, 3, 5)            # (B, nh, nw, c, p, p)
    return x.reshape(b, nh * nw, c * p * p)


# -------------------------------------------------------------------- in-kernel math

def _layer_norm(x, gamma, beta, eps=1e-5):
    mean = jnp.mean(x, axis=-1, keepdims=True)
    var = jnp.mean(jnp.square(x - mean), axis=-1, keepdims=True)
    inv = jax.lax.rsqrt(var + eps)
    return (x - mean) * inv * gamma + beta


def _erf(x):
    # Abramowitz & Stegun 7.1.26 (max abs err ~1.5e-7); VPU/EUP-safe ops only.
    a1, a2, a3, a4, a5 = (0.254829592, -0.284496736, 1.421413741,
                          -1.453152027, 1.061405429)
    pconst = 0.3275911
    ax = jnp.abs(x)
    t = 1.0 / (1.0 + pconst * ax)
    poly = ((((a5 * t + a4) * t + a3) * t + a2) * t + a1) * t
    y = 1.0 - poly * jnp.exp(-ax * ax)
    return jnp.where(x < 0.0, -y, y)


def _gelu(x):
    # x * 0.5 * (1 + erf(x / sqrt(2)))  -- exact-gelu of the reference module.
    return x * 0.5 * (1.0 + _erf(x * 0.7071067811865476))


# --------------------------------------------------------------------------- kernels

def tokenize_kernel(p_ref, w_ref, b_ref, cls_ref, pos_ref, o_ref,
                    *, num_patches, n_valid, n_pad):
    """Patch-embed matmul fused with cls-token prepend, pos-embed add and padding."""
    bt, np_, pd = p_ref.shape
    emb = w_ref.shape[1]
    p2 = p_ref[...].reshape(bt * np_, pd).astype(jnp.bfloat16)
    pe = jnp.dot(p2, w_ref[...], preferred_element_type=jnp.float32) + b_ref[...]
    pe3 = pe.reshape(bt, np_, emb) + pos_ref[...][None, :, :]
    o_ref[:, 1:1 + np_, :] = pe3.astype(o_ref.dtype)
    o_ref[:, 0:1, :] = jnp.broadcast_to(cls_ref[...], (bt, 1, emb)).astype(o_ref.dtype)
    if n_pad > n_valid:
        o_ref[:, n_valid:, :] = jnp.zeros((bt, n_pad - n_valid, emb), o_ref.dtype)


def blocks_kernel(x_ref,
                  ln1_g, ln1_b, wq, wk, wv, wproj, bproj,
                  ln2_g, ln2_b, w1, b1, w2, b2,
                  out_ref, acc_ref,
                  *, num_heads, n_pad, n_valid, scale, batch_tile):
    """One grid step = one transformer block applied to one row tile.

    grid = (row_tiles, depth); the activation tile lives in acc_ref (f32 VMEM scratch)
    for the whole depth loop, the per-depth weight slice is streamed in by index_map.
    """
    d = pl.program_id(1)
    depth = pl.num_programs(1)
    rows, emb = acc_ref.shape
    hd = emb // num_heads

    @pl.when(d == 0)
    def _():
        acc_ref[...] = x_ref[...].astype(jnp.float32)

    x = acc_ref[...]

    # ---------------- attention ----------------
    h = _layer_norm(x, ln1_g[...], ln1_b[...]).astype(jnp.bfloat16)

    if n_valid < n_pad:   # mask padded keys (padded rows carry no information)
        key_ok3 = jax.lax.broadcasted_iota(
            jnp.int32, (batch_tile, n_pad, n_pad), 2) < n_valid

    y = x + bproj[...]                                # residual + proj bias
    for hh in range(num_heads):                       # H static iters, batched over batch
        q = jnp.dot(h, wq[hh], preferred_element_type=jnp.float32).astype(jnp.bfloat16)
        k = jnp.dot(h, wk[hh], preferred_element_type=jnp.float32).astype(jnp.bfloat16)
        v = jnp.dot(h, wv[hh], preferred_element_type=jnp.float32).astype(jnp.bfloat16)
        q3 = q.reshape(batch_tile, n_pad, hd)         # free sublane split (n_pad % 8 == 0)
        k3 = k.reshape(batch_tile, n_pad, hd)
        v3 = v.reshape(batch_tile, n_pad, hd)

        s = jnp.einsum('bqd,bkd->bqk', q3, k3,
                       preferred_element_type=jnp.float32) * scale
        if n_valid < n_pad:
            s = jnp.where(key_ok3, s, -1e9)           # keep mask in f32 score path
        s = s - jnp.max(s, axis=-1, keepdims=True)
        e = jnp.exp(s)
        p = (e * pl.reciprocal(jnp.sum(e, axis=-1, keepdims=True), approx=True)
             ).astype(jnp.bfloat16)
        o3 = jnp.einsum('bqk,bkd->bqd', p, v3, preferred_element_type=jnp.float32)

        # accumulate this head's projection (per-head row slice of W_proj) -> no concat
        o = o3.reshape(rows, hd).astype(jnp.bfloat16)
        y = y + jnp.dot(o, wproj[hh], preferred_element_type=jnp.float32)

    # ------------------ MLP --------------------
    h2 = _layer_norm(y, ln2_g[...], ln2_b[...]).astype(jnp.bfloat16)
    m = jnp.dot(h2, w1[...], preferred_element_type=jnp.float32) + b1[...]
    m = _gelu(m).astype(jnp.bfloat16)
    y = y + jnp.dot(m, w2[...], preferred_element_type=jnp.float32) + b2[...]

    # keep padded token rows exactly zero: one full-tile masked select, lane-dense store
    if n_valid < n_pad:
        seq_idx = jax.lax.broadcasted_iota(jnp.int32, (rows, 1), 0) % n_pad
        y = jnp.where(seq_idx < n_valid, y, 0.0)

    acc_ref[...] = y

    @pl.when(d == depth - 1)
    def _():
        out_ref[...] = acc_ref[...].astype(out_ref.dtype)


def head_kernel(x_ref, g_ref, beta_ref, w_ref, b_ref, out_ref):
    h = _layer_norm(x_ref[...].astype(jnp.float32), g_ref[...], beta_ref[...])
    acc = jnp.dot(h.astype(jnp.bfloat16), w_ref[...],
                  preferred_element_type=jnp.float32) + b_ref[...]
    out_ref[...] = acc.astype(out_ref.dtype)


# ------------------------------------------------------------------------ pallas_call wrappers

def tokenize_forward(patches3, w_pe, b_pe, cls_plus, pos_patch, *, n_valid, n_pad):
    B, np_, pd = patches3.shape
    emb = w_pe.shape[1]
    divs = [d for d in range(1, B + 1) if B % d == 0]
    bt = max([d for d in divs if d * np_ <= 512] or [1])
    grid = (B // bt,)
    kernel = functools.partial(tokenize_kernel, num_patches=np_,
                               n_valid=n_valid, n_pad=n_pad)
    return pl.pallas_call(
        kernel,
        out_shape=jax.ShapeDtypeStruct((B, n_pad, emb), jnp.float32),
        grid_spec=pltpu.PrefetchScalarGridSpec(
            num_scalar_prefetch=0, grid=grid,
            in_specs=[pl.BlockSpec((bt, np_, pd), lambda i: (i, 0, 0)),
                      pl.BlockSpec(w_pe.shape, lambda i: (0, 0)),
                      pl.BlockSpec(b_pe.shape, lambda i: (0, 0)),
                      pl.BlockSpec(cls_plus.shape, lambda i: (0, 0)),
                      pl.BlockSpec(pos_patch.shape, lambda i: (0, 0))],
            out_specs=pl.BlockSpec((bt, n_pad, emb), lambda i: (i, 0, 0))),
        compiler_params=pltpu.CompilerParams(
            dimension_semantics=("parallel",),
            vmem_limit_bytes=32 * 1024 * 1024),
    )(patches3, w_pe, b_pe, cls_plus, pos_patch)


def blocks_forward(x2d, sb, *, num_heads, n_pad, n_valid, batch_tile, depth):
    rows_total, emb = x2d.shape
    hd = emb // num_heads
    tile_rows = batch_tile * n_pad
    grid = (rows_total // tile_rows, depth)

    # Activation tile: constant along the depth axis -> fetched/written once per row tile.
    x_spec = pl.BlockSpec((tile_rows, emb), lambda i, d: (i, 0))

    def wspec(a):
        # Per-depth weight slice: leading (depth) dim indexed by the depth grid axis
        # and squeezed out of the kernel ref; small slices stream while compute runs.
        trailing = a.shape[1:]
        zeros = (0,) * len(trailing)
        return pl.BlockSpec((None,) + trailing, lambda i, d, z=zeros: (d,) + z)

    kernel = functools.partial(blocks_kernel, num_heads=num_heads, n_pad=n_pad,
                               n_valid=n_valid, scale=hd ** -0.5,
                               batch_tile=batch_tile)
    return pl.pallas_call(
        kernel,
        out_shape=jax.ShapeDtypeStruct((rows_total, emb), jnp.float32),
        grid_spec=pltpu.PrefetchScalarGridSpec(
            num_scalar_prefetch=0, grid=grid,
            in_specs=[x_spec,
                      wspec(sb['ln1_g']), wspec(sb['ln1_b']),
                      wspec(sb['wq']), wspec(sb['wk']), wspec(sb['wv']),
                      wspec(sb['wproj']), wspec(sb['bproj']),
                      wspec(sb['ln2_g']), wspec(sb['ln2_b']),
                      wspec(sb['w1']), wspec(sb['b1']),
                      wspec(sb['w2']), wspec(sb['b2'])],
            out_specs=x_spec,
            scratch_shapes=[pltpu.VMEM((tile_rows, emb), jnp.float32)]),
        compiler_params=pltpu.CompilerParams(
            dimension_semantics=("parallel", "arbitrary"),
            vmem_limit_bytes=32 * 1024 * 1024),
    )(x2d,
      sb['ln1_g'], sb['ln1_b'],
      sb['wq'], sb['wk'], sb['wv'],
      sb['wproj'], sb['bproj'],
      sb['ln2_g'], sb['ln2_b'],
      sb['w1'], sb['b1'], sb['w2'], sb['b2'])


def head_forward(x_cls, ln_g, ln_b, w_head, b_head):
    batch, emb = x_cls.shape
    nc = w_head.shape[1]
    return pl.pallas_call(
        head_kernel,
        out_shape=jax.ShapeDtypeStruct((batch, nc), jnp.float32),
        grid_spec=pltpu.PrefetchScalarGridSpec(
            num_scalar_prefetch=0, grid=(1,),
            in_specs=[pl.BlockSpec((batch, emb), lambda i: (0, 0)),
                      pl.BlockSpec(ln_g.shape, lambda i: (0, 0)),
                      pl.BlockSpec(ln_b.shape, lambda i: (0, 0)),
                      pl.BlockSpec(w_head.shape, lambda i: (0, 0)),
                      pl.BlockSpec(b_head.shape, lambda i: (0, 0))],
            out_specs=pl.BlockSpec((batch, nc), lambda i: (0, 0))),
        compiler_params=pltpu.CompilerParams(
            dimension_semantics=("arbitrary",)),
    )(x_cls, ln_g, ln_b, w_head, b_head)


def discriminator_forward(x_img, kp, cfg):
    B = x_img.shape[0]
    p = cfg['patch_size']
    emb = cfg['embed_dim']
    num_patches = (cfg['img_size'] // p) ** 2
    n_valid = num_patches + 1                 # patches + cls token
    n_pad = _round_up(n_valid, 8)             # sublane-aligned sequence length

    # 1) patchify (layout glue) + fused tokenize kernel (conv-as-matmul + cls + pos + pad)
    patches3 = _patchify(x_img, p)
    tokens = tokenize_forward(patches3, kp['w_pe'], kp['b_pe'],
                              kp['cls_plus'], kp['pos_patch'],
                              n_valid=n_valid, n_pad=n_pad)       # (B, n_pad, emb) f32

    # 2) all transformer blocks in ONE pallas_call (depth is an 'arbitrary' grid axis;
    #    no attention mask: Discriminator builds its Blocks with is_mask=0)
    batch_tile = _pick_batch_tile(B, n_pad, _dual_tensorcore())
    x2d = tokens.reshape(B * n_pad, emb)
    x2d = blocks_forward(x2d, kp['blocks'], num_heads=cfg['num_heads'],
                         n_pad=n_pad, n_valid=n_valid,
                         batch_tile=batch_tile, depth=cfg['depth'])

    # 3) final norm + classification head on the cls token
    # TODO(synk): this tiny LN+head could be folded into the last depth step of the
    #             fused block kernel; kept as a separate sub-microsecond call for clarity.
    cls_out = x2d.reshape(B, n_pad, emb)[:, 0, :]
    return head_forward(cls_out, kp['ln_g'], kp['ln_b'],
                        kp['w_head'], kp['b_head'])


# ------------------------------------------------------------------------ params + reference

def make_params(key, cfg):
    emb = cfg['embed_dim']
    p = cfg['patch_size']
    num_patches = (cfg['img_size'] // p) ** 2
    n = num_patches + 1
    pd = 3 * p * p
    hidden = int(emb * cfg['mlp_ratio'])

    def nrm(k, shape, std=0.02):
        return std * jax.random.normal(k, shape, jnp.float32)

    keys = iter(jax.random.split(key, 16 + cfg['depth'] * 16))
    params = {
        'w_pe': nrm(next(keys), (pd, emb)),
        'b_pe': nrm(next(keys), (1, emb)),
        'cls_token': nrm(next(keys), (1, 1, emb)),
        'pos_embed': nrm(next(keys), (1, n, emb)),
        'ln_g': 1.0 + nrm(next(keys), (1, emb)),
        'ln_b': nrm(next(keys), (1, emb)),
        'w_head': nrm(next(keys), (emb, cfg['num_classes'])),
        'b_head': nrm(next(keys), (1, cfg['num_classes'])),
        'blocks': [],
    }
    for _ in range(cfg['depth']):
        params['blocks'].append({
            'ln1_g': 1.0 + nrm(next(keys), (1, emb)),
            'ln1_b': nrm(next(keys), (1, emb)),
            'wqkv': nrm(next(keys), (emb, 3 * emb)),      # qkv_bias=False in the module
            'wproj': nrm(next(keys), (emb, emb)),
            'bproj': nrm(next(keys), (1, emb)),
            'ln2_g': 1.0 + nrm(next(keys), (1, emb)),
            'ln2_b': nrm(next(keys), (1, emb)),
            'w1': nrm(next(keys), (emb, hidden)),
            'b1': nrm(next(keys), (1, hidden)),
            'w2': nrm(next(keys), (hidden, emb)),
            'b2': nrm(next(keys), (1, emb)),
        })
    return params


def prepare_kernel_params(params, cfg):
    """One-time weight re-layout + bf16 pre-cast for the kernels."""
    emb = cfg['embed_dim']
    H = cfg['num_heads']
    hd = emb // H
    depth = cfg['depth']
    blocks = params['blocks']

    def st(name):
        return jnp.stack([b[name] for b in blocks], axis=0)

    wqkv = st('wqkv')                                         # (depth, emb, 3*emb)

    def heads_cols(w):                                        # -> (depth, H, emb, hd)
        return w.reshape(depth, emb, H, hd).transpose(0, 2, 1, 3).astype(jnp.bfloat16)

    stacked = dict(
        ln1_g=st('ln1_g'), ln1_b=st('ln1_b'),
        wq=heads_cols(wqkv[:, :, 0:emb]),
        wk=heads_cols(wqkv[:, :, emb:2 * emb]),
        wv=heads_cols(wqkv[:, :, 2 * emb:3 * emb]),
        wproj=st('wproj').reshape(depth, H, hd, emb).astype(jnp.bfloat16),
        bproj=st('bproj'),
        ln2_g=st('ln2_g'), ln2_b=st('ln2_b'),
        w1=st('w1').astype(jnp.bfloat16), b1=st('b1'),
        w2=st('w2').astype(jnp.bfloat16), b2=st('b2'))

    return dict(
        w_pe=params['w_pe'].astype(jnp.bfloat16),
        b_pe=params['b_pe'],
        cls_plus=params['cls_token'][0] + params['pos_embed'][0, 0:1],   # (1, emb)
        pos_patch=params['pos_embed'][0, 1:],                            # (np, emb)
        blocks=stacked,
        ln_g=params['ln_g'], ln_b=params['ln_b'],
        w_head=params['w_head'].astype(jnp.bfloat16),
        b_head=params['b_head'])


def _ref_layer_norm(x, g, b, eps=1e-5):
    mean = jnp.mean(x, axis=-1, keepdims=True)
    var = jnp.mean(jnp.square(x - mean), axis=-1, keepdims=True)
    return (x - mean) / jnp.sqrt(var + eps) * g + b


def reference_forward(x_img, params, cfg):
    """Pure-JAX f32 reference mirroring the PyTorch Discriminator forward (eval mode)."""
    batch = x_img.shape[0]
    p = cfg['patch_size']
    emb = cfg['embed_dim']
    heads = cfg['num_heads']
    num_patches = (cfg['img_size'] // p) ** 2
    n = num_patches + 1
    hd = emb // heads
    scale = hd ** -0.5

    patches = _patchify(x_img, p)
    pe = patches @ params['w_pe'] + params['b_pe']
    cls = jnp.broadcast_to(params['cls_token'], (batch, 1, emb))
    x = jnp.concatenate([cls, pe], axis=1) + params['pos_embed']

    for bp in params['blocks']:
        h = _ref_layer_norm(x, bp['ln1_g'], bp['ln1_b'])
        qkv = h @ bp['wqkv']                                   # bias=False
        qkv = qkv.reshape(batch, n, 3, heads, hd).transpose(2, 0, 3, 1, 4)
        q, k, v = qkv[0], qkv[1], qkv[2]
        attn = jnp.einsum('bhnd,bhmd->bhnm', q, k) * scale
        attn = jax.nn.softmax(attn, axis=-1)
        o = jnp.einsum('bhnm,bhmd->bhnd', attn, v)
        o = o.transpose(0, 2, 1, 3).reshape(batch, n, emb)
        x = x + (o @ bp['wproj'] + bp['bproj'])
        h = _ref_layer_norm(x, bp['ln2_g'], bp['ln2_b'])
        h = h @ bp['w1'] + bp['b1']
        h = jax.nn.gelu(h, approximate=False)                  # exact erf-gelu
        x = x + (h @ bp['w2'] + bp['b2'])

    x = _ref_layer_norm(x, params['ln_g'], params['ln_b'])
    return x[:, 0, :] @ params['w_head'] + params['b_head']


# --------------------------------------------------------------------------------- main

if __name__ == "__main__":
    cfg = dict(img_size=32, patch_size=8, embed_dim=128, depth=2,
               num_heads=4, mlp_ratio=4.0, num_classes=1)
    B = 8

    key = jax.random.PRNGKey(0)
    kx, kp = jax.random.split(key)
    x_img = jax.random.normal(kx, (B, 3, cfg['img_size'], cfg['img_size']), jnp.float32)
    params = make_params(kp, cfg)
    kparams = prepare_kernel_params(params, cfg)

    out = discriminator_forward(x_img, kparams, cfg)
    out = jax.block_until_ready(out)

    ref = reference_forward(x_img, params, cfg)
    assert out.shape == (B, cfg['num_classes'])
    # bf16 matmuls (f32 accumulation) vs the f32 reference -> relaxed tolerance.
    assert jnp.allclose(out, ref, atol=2e-2, rtol=2e-2), \
        float(jnp.max(jnp.abs(out - ref)))

    print("KERNEL_OK")
</pallas_src>

<mosaic_0001>
module attributes {stable_mosaic.version = 11 : i64} {
  func.func @tokenize_kernel(%arg0: i32, %arg1: memref<8x16x192xf32, #tpu.memory_space<vmem>>, %arg2: memref<192x128xbf16, #tpu.memory_space<vmem>>, %arg3: memref<1x128xf32, #tpu.memory_space<vmem>>, %arg4: memref<1x128xf32, #tpu.memory_space<vmem>>, %arg5: memref<16x128xf32, #tpu.memory_space<vmem>>, %arg6: memref<8x24x128xf32, #tpu.memory_space<vmem>>) attributes {dimension_semantics = [#tpu.dimension_semantics<parallel>], iteration_bounds = array<i64: 1>, scalar_prefetch = 0 : i64, scratch_operands = 0 : i64, tpu.core_type = #tpu.core_type<tc>, window_params = [{transform_indices = @transform_0, window_bounds = array<i64: 8, 16, 192>}, {pipeline_mode = #tpu.pipeline_mode<synchronous>, transform_indices = @transform_1, window_bounds = array<i64: 192, 128>}, {pipeline_mode = #tpu.pipeline_mode<synchronous>, transform_indices = @transform_2, window_bounds = array<i64: 1, 128>}, {pipeline_mode = #tpu.pipeline_mode<synchronous>, transform_indices = @transform_3, window_bounds = array<i64: 1, 128>}, {pipeline_mode = #tpu.pipeline_mode<synchronous>, transform_indices = @transform_4, window_bounds = array<i64: 16, 128>}, {transform_indices = @transform_5, window_bounds = array<i64: 8, 24, 128>}]} {
    %c0 = arith.constant 0 : index
    %c0_0 = arith.constant 0 : index
    %c0_1 = arith.constant 0 : index
    %0 = vector.load %arg1[%c0, %c0_0, %c0_1] : memref<8x16x192xf32, #tpu.memory_space<vmem>>, vector<8x16x192xf32>
    %1 = vector.shape_cast %0 : vector<8x16x192xf32> to vector<128x192xf32>
    %2 = arith.truncf %1 : vector<128x192xf32> to vector<128x192xbf16>
    %c0_2 = arith.constant 0 : index
    %c0_3 = arith.constant 0 : index
    %3 = vector.load %arg2[%c0_2, %c0_3] : memref<192x128xbf16, #tpu.memory_space<vmem>>, vector<192x128xbf16>
    %cst = arith.constant dense<0.000000e+00> : vector<128x128xf32>
    %4 = tpu.matmul %2, %3, %cst {dimension_numbers = #tpu.dot_dimension_numbers<[1], [0], [0], [1], [0, 0, 1, 1], [], []>} : vector<128x192xbf16>, vector<192x128xbf16>, vector<128x128xf32> -> vector<128x128xf32>
    %c0_4 = arith.constant 0 : index
    %c0_5 = arith.constant 0 : index
    %5 = vector.load %arg3[%c0_4, %c0_5] : memref<1x128xf32, #tpu.memory_space<vmem>>, vector<1x128xf32>
    %6 = vector.broadcast %5 : vector<1x128xf32> to vector<128x128xf32>
    %7 = arith.addf %4, %6 : vector<128x128xf32>
    %8 = vector.shape_cast %7 : vector<128x128xf32> to vector<8x16x128xf32>
    %c0_6 = arith.constant 0 : index
    %c0_7 = arith.constant 0 : index
    %9 = vector.load %arg5[%c0_6, %c0_7] : memref<16x128xf32, #tpu.memory_space<vmem>>, vector<16x128xf32>
    %10 = vector.shape_cast %9 : vector<16x128xf32> to vector<1x16x128xf32>
    %11 = vector.broadcast %10 : vector<1x16x128xf32> to vector<8x16x128xf32>
    %12 = arith.addf %8, %11 : vector<8x16x128xf32>
    %c0_8 = arith.constant 0 : index
    %c1 = arith.constant 1 : index
    %c0_9 = arith.constant 0 : index
    %13 = vector.load %arg6[%c0_8, %c1, %c0_9] : memref<8x24x128xf32, #tpu.memory_space<vmem>>, vector<8x16x128xf32>
    tpu.vector_store %arg6[%c0_8, %c1, %c0_9], %12 {strides = array<i32>} : memref<8x24x128xf32, #tpu.memory_space<vmem>>, vector<8x16x128xf32>,
    %c0_10 = arith.constant 0 : index
    %c0_11 = arith.constant 0 : index
    %14 = vector.load %arg4[%c0_10, %c0_11] : memref<1x128xf32, #tpu.memory_space<vmem>>, vector<1x128xf32>
    %15 = vector.shape_cast %14 : vector<1x128xf32> to vector<1x1x128xf32>
    %16 = vector.broadcast %15 : vector<1x1x128xf32> to vector<8x1x128xf32>
    %c0_12 = arith.constant 0 : index
    %c0_13 = arith.constant 0 : index
    %c0_14 = arith.constant 0 : index
    %17 = vector.load %arg6[%c0_12, %c0_13, %c0_14] : memref<8x24x128xf32, #tpu.memory_space<vmem>>, vector<8x1x128xf32>
    tpu.vector_store %arg6[%c0_12, %c0_13, %c0_14], %16 {strides = array<i32>} : memref<8x24x128xf32, #tpu.memory_space<vmem>>, vector<8x1x128xf32>,
    %cst_15 = arith.constant 0.000000e+00 : f32
    %18 = vector.broadcast %cst_15 : f32 to vector<8x7x128xf32>
    %c0_16 = arith.constant 0 : index
    %c17 = arith.constant 17 : index
    %c0_17 = arith.constant 0 : index
    %19 = vector.load %arg6[%c0_16, %c17, %c0_17] : memref<8x24x128xf32, #tpu.memory_space<vmem>>, vector<8x7x128xf32>
    tpu.vector_store %arg6[%c0_16, %c17, %c0_17], %18 {strides = array<i32>} : memref<8x24x128xf32, #tpu.memory_space<vmem>>, vector<8x7x128xf32>,
    return
  }
  func.func @transform_0(%arg0: i32) -> (i32, i32, i32) {
    %c0_i32 = arith.constant 0 : i32
    %c0_i32_0 = arith.constant 0 : i32
    %c0_i32_1 = arith.constant 0 : i32
    return %arg0, %c0_i32, %c0_i32_0 : i32, i32, i32
  }
  func.func @transform_1(%arg0: i32) -> (i32, i32) {
    %c0_i32 = arith.constant 0 : i32
    %c0_i32_0 = arith.constant 0 : i32
    %c0_i32_1 = arith.constant 0 : i32
    return %c0_i32, %c0_i32_0 : i32, i32
  }
  func.func @transform_2(%arg0: i32) -> (i32, i32) {
    %c0_i32 = arith.constant 0 : i32
    %c0_i32_0 = arith.constant 0 : i32
    %c0_i32_1 = arith.constant 0 : i32
    return %c0_i32, %c0_i32_0 : i32, i32
  }
  func.func @transform_3(%arg0: i32) -> (i32, i32) {
    %c0_i32 = arith.constant 0 : i32
    %c0_i32_0 = arith.constant 0 : i32
    %c0_i32_1 = arith.constant 0 : i32
    return %c0_i32, %c0_i32_0 : i32, i32
  }
  func.func @transform_4(%arg0: i32) -> (i32, i32) {
    %c0_i32 = arith.constant 0 : i32
    %c0_i32_0 = arith.constant 0 : i32
    %c0_i32_1 = arith.constant 0 : i32
    return %c0_i32, %c0_i32_0 : i32, i32
  }
  func.func @transform_5(%arg0: i32) -> (i32, i32, i32) {
    %c0_i32 = arith.constant 0 : i32
    %c0_i32_0 = arith.constant 0 : i32
    %c0_i32_1 = arith.constant 0 : i32
    return %arg0, %c0_i32, %c0_i32_0 : i32, i32, i32
  }
}

</mosaic_0001>

<bundles_post_ra>
// kernel: tpu_custom_call.1
= control target key start
LH: loop header
LB: loop body
LE: loop exit
PB: predicated region body
PF: predicated region fallthrough
CT: control target
= control target key end

     0   :  { %10 = vsyncpa [#allocation3], 0  ;;  %s719_s0 = inlined_call_operand.hbm [shape: f32[8,16,192], index: 0, kind: input, shape index: {}]   ;;  %s720_s1 = inlined_call_operand.hbm [shape: bf16[192,128], index: 1, kind: input, shape index: {}]   ;;  %s721_s2 = inlined_call_operand.vmem [shape: f32[1,128], index: 2, kind: input, shape index: {}]   ;;  %s722_s3 = inlined_call_operand.vmem [shape: f32[1,128], index: 3, kind: input, shape index: {}]   ;;  %s723_s4 = inlined_call_operand.hbm [shape: f32[16,128], index: 4, kind: input, shape index: {}]   ;;  %s724_s5 = inlined_call_operand.hbm [shape: f32[8,24,128], index: 5, kind: output, shape index: {}]  }
   0x1   :  { %11 = vsyncpa [#allocation6], 0  ;;  %s30_s20 = sshll.u32 %s720_s1, 4  ;;  %s31_s20 = int_to_ptr.hbm [resolvable:$true] %s30_s20 }
   0x2   :  { %12 = vsyncpa [#allocation4], 0  ;;  %s605_s21 = smov [#allocation5]   ;;  %s17_s25 = sshll.u32 %s719_s0, 4  ;;  %s18_s25 = int_to_ptr.hbm [resolvable:$true] %s17_s25 }
   0x3   :  { %s32_s22 = sshll.u32 %s605_s21, 4  ;;  %s606_s26 = smov 64   ;;  %s33_s22 = int_to_ptr.vmem [resolvable:$true] %s32_s22 }
   0x4   :  { %s607_s27 = smov 4   ;;  %s608_s28 = smov [#allocation2]  }
   0x5   :  { %38 = dma.hbm_to_vmem [thread:$0]  %s31_s20, 1536, %s33_s22, [#allocation6], %s606_s26, %s606_s26, %s607_s27  }
   0x6   :  { %s19_s29 = sshll.u32 %s608_s28, 4  ;;  %s609_s30 = smov 256   ;;  %s20_s29 = int_to_ptr.vmem [resolvable:$true] %s19_s29 }
   0x7   :  { %s610_s6 = smov 16   ;;  %s47_s8 = sshll.u32 %s723_s4, 4  ;;  %s48_s8 = int_to_ptr.hbm [resolvable:$true] %s47_s8 }
   0x8   :  { %25 = dma.hbm_to_vmem [thread:$0]  %s18_s25, 4096, %s20_s29, [#allocation3], %s609_s30, %s609_s30, %s610_s6  }
   0x9   :  { %s611_s9 = smov [#allocation7]   ;;  %s612_s11 = smov 128  }
   0xa   :  { %s49_s10 = sshll.u32 %s611_s9, 4  ;;  %s613_s0 = smov 8   ;;  %s50_s10 = int_to_ptr.vmem [resolvable:$true] %s49_s10 }
   0xb   :  { %55 = dma.hbm_to_vmem [thread:$0]  %s48_s8, 256, %s50_s10, [#allocation6], %s612_s11, %s612_s11, %s613_s0  }
   0xc   :  { %599 = dma.done.wait [#allocation3], 4096  }
   0xd   :  { %600 = vsyncadd [#allocation3], 4294963200 }
   0xe   :  { %601 = dma.done.wait [#allocation6], 1792  }
   0xf   :  { %602 = vsyncadd [#allocation6], 4294965504  ;;  %v474_v0 = vld [vmem:[#allocation5 + $0x38] sm:$0xff]  ;;  %v473_v2 = vld [vmem:[#allocation5 + $0x30] sm:$0xff]  ;;  %vm217_vm0 = vcmask 523264   ;;  %s397_s17 = sshll.u32 %s724_s5, 4  ;;  %s398_s17 = int_to_ptr.hbm [resolvable:$true] %s397_s17 }
  0x10   :  { %v478_v1 = vld [vmem:[#allocation5 + $0x58] sm:$0xff]  ;;  %242 = vmatpush.bf16.msra.mxu0 %v474_v0  ;;  %479 = vmatpush.bf16.msra.mxu2 %v474_v0  ;;  %v477_v3 = vld [vmem:[#allocation5 + $0x50] sm:$0xff]  ;;  %v472_v4 = vld [vmem:[#allocation5 + $0x28] sm:$0xff] }
  0x11   :  { %295 = vmatpush.bf16.msra.mxu1 %v478_v1  ;;  %487 = vmatpush.bf16.msra.mxu3 %v478_v1  ;;  %v476_v5 = vld [vmem:[#allocation5 + $0x48] sm:$0xff]  ;;  %v471_v6 = vld [vmem:[#allocation5 + $0x20] sm:$0xff]  ;;  %v72_v9 = vld [vmem:[#allocation2 + $0x18] sm:$0xff] }
  0x12   :  { %v475_v7 = vld [vmem:[#allocation5 + $0x40] sm:$0xff]  ;;  %v70_v8 = vld [vmem:[#allocation2 + $0x8] sm:$0xff]  ;;  %v92_v11 = vld [vmem:[#allocation2 + $0xb8] sm:$0xff] }
  0x13   :  { %v90_v10 = vld [vmem:[#allocation2 + $0xa8] sm:$0xff]  ;;  %v102_v12 = vpack.c.bf16 %v72_v9, %v70_v8  ;;  %v470_v13 = vld [vmem:[#allocation5 + $0x18] sm:$0xff]  ;;  %v469_v15 = vld [vmem:[#allocation5 + $0x10] sm:$0xff] }
  0x14   :  { %243 = vmatpush.bf16.msra.mxu0 %v473_v2  ;;  %480 = vmatpush.bf16.msra.mxu2 %v473_v2  ;;  %v112_v14 = vpack.c.bf16 %v92_v11, %v90_v10  ;;  %v468_v16 = vld [vmem:[#allocation5 + $0x8] sm:$0xff]  ;;  %v467_v17 = vld [vmem:[#allocation5] sm:$0xff]  ;;  %v71_v19 = vld [vmem:[#allocation2 + $0x10] sm:$0xff] }
  0x15   :  { %296 = vmatpush.bf16.msra.mxu1 %v477_v3  ;;  %488 = vmatpush.bf16.msra.mxu3 %v477_v3  ;;  %v69_v18 = vld [vmem:[#allocation2] sm:$0xff]  ;;  %v87_v21 = vld [vmem:[#allocation2 + $0x90] sm:$0xff]  ;;  %v74_v22 = vld [vmem:[#allocation2 + $0x28] sm:$0xff] }
  0x16   :  { %v85_v20 = vld [vmem:[#allocation2 + $0x80] sm:$0xff]  ;;  %v76_v23 = vld [vmem:[#allocation2 + $0x38] sm:$0xff]  ;;  %v94_v24 = vld [vmem:[#allocation2 + $0xc8] sm:$0xff]  ;;  %v101_v26 = vpack.c.bf16 %v71_v19, %v69_v18 }
  0x17   :  { %v96_v25 = vld [vmem:[#allocation2 + $0xd8] sm:$0xff]  ;;  %v109_v27 = vpack.c.bf16 %v87_v21, %v85_v20  ;;  %v104_v28 = vpack.c.bf16 %v76_v23, %v74_v22  ;;  %v73_v30 = vld [vmem:[#allocation2 + $0x20] sm:$0xff]  ;;  %v75_v31 = vld [vmem:[#allocation2 + $0x30] sm:$0xff] }
  0x18   :  { %244 = vmatpush.bf16.msra.mxu0 %v472_v4  ;;  %481 = vmatpush.bf16.msra.mxu2 %v472_v4  ;;  %v114_v29 = vpack.c.bf16 %v96_v25, %v94_v24  ;;  %v89_v32 = vld [vmem:[#allocation2 + $0xa0] sm:$0xff]  ;;  %v91_v33 = vld [vmem:[#allocation2 + $0xb0] sm:$0xff]  ;;  %v78_v34 = vld [vmem:[#allocation2 + $0x48] sm:$0xff]  ;;  %v103_v38 = vpack.c.bf16 %v75_v31, %v73_v30 }
  0x19   :  { %297 = vmatpush.bf16.msra.mxu1 %v476_v5  ;;  %489 = vmatpush.bf16.msra.mxu3 %v476_v5  ;;  %v80_v35 = vld [vmem:[#allocation2 + $0x58] sm:$0xff]  ;;  %v98_v36 = vld [vmem:[#allocation2 + $0xe8] sm:$0xff]  ;;  %v111_v39 = vpack.c.bf16 %v91_v33, %v89_v32  ;;  %v77_v42 = vld [vmem:[#allocation2 + $0x40] sm:$0xff] }
  0x1a   :  { %v100_v37 = vld [vmem:[#allocation2 + $0xf8] sm:$0xff]  ;;  %v106_v40 = vpack.c.bf16 %v80_v35, %v78_v34  ;;  %v79_v43 = vld [vmem:[#allocation2 + $0x50] sm:$0xff]  ;;  %v93_v44 = vld [vmem:[#allocation2 + $0xc0] sm:$0xff] }
  0x1b   :  { %v116_v41 = vpack.c.bf16 %v100_v37, %v98_v36  ;;  %v95_v45 = vld [vmem:[#allocation2 + $0xd0] sm:$0xff]  ;;  %v82_v46 = vld [vmem:[#allocation2 + $0x68] sm:$0xff]  ;;  %v84_v47 = vld [vmem:[#allocation2 + $0x78] sm:$0xff]  ;;  %v105_v48 = vpack.c.bf16 %v79_v43, %v77_v42 }
  0x1c   :  { %245 = vmatpush.bf16.msra.mxu0 %v471_v6  ;;  %482 = vmatpush.bf16.msra.mxu2 %v471_v6  ;;  %v113_v49 = vpack.c.bf16 %v95_v45, %v93_v44  ;;  %v108_v50 = vpack.c.bf16 %v84_v47, %v82_v46  ;;  %v81_v51 = vld [vmem:[#allocation2 + $0x60] sm:$0xff]  ;;  %v83_v52 = vld [vmem:[#allocation2 + $0x70] sm:$0xff]  ;;  %v86_v55 = vld [vmem:[#allocation2 + $0x88] sm:$0xff] }
  0x1d   :  { %298 = vmatpush.bf16.msra.mxu1 %v475_v7  ;;  %490 = vmatpush.bf16.msra.mxu3 %v475_v7  ;;  %v97_v53 = vld [vmem:[#allocation2 + $0xe0] sm:$0xff]  ;;  %v99_v54 = vld [vmem:[#allocation2 + $0xf0] sm:$0xff]  ;;  %v88_v56 = vld [vmem:[#allocation2 + $0x98] sm:$0xff]  ;;  %v107_v57 = vpack.c.bf16 %v83_v52, %v81_v51 }
  0x1e   :  { %v115_v58 = vpack.c.bf16 %v99_v54, %v97_v53  ;;  %v110_v59 = vpack.c.bf16 %v88_v56, %v86_v55  ;;  %v669_v62 = vld [vmem:[%s721_s2] ss:$0 sm:$0xff]  ;;  %v676_v9 = vld [vmem:[#allocation7 + $0x8] sm:$0xff] }
  0x1f   :  { %v672_v2 = vld [vmem:[#allocation7] sm:$0xff] }
  0x20   :  { %459 = vmatmul.msk.bf16.vlgmr.msra.gmra.mxu1 %vm217_vm0, %v102_v12  ;;  %246 = vmatpush.bf16.msra.mxu0 %v470_v13 }
  0x21   :  { %483 = vmatpush.bf16.msra.mxu2 %v470_v13  ;;  %464 = vmatmul.msk.bf16.vlgmr.msra.gmra.mxu3 %vm217_vm0, %v112_v14 }
  0x24   :  { %247 = vmatpush.bf16.msra.mxu0 %v469_v15 }
  0x25   :  { %484 = vmatpush.bf16.msra.mxu2 %v469_v15 }
  0x28   :  { %248 = vmatpush.bf16.msra.mxu0 %v468_v16 }
  0x29   :  { %485 = vmatpush.bf16.msra.mxu2 %v468_v16 }
  0x2c   :  { %249 = vmatpush.bf16.msra.mxu0 %v467_v17 }
  0x2d   :  { %486 = vmatpush.bf16.msra.mxu2 %v467_v17 }
  0x2f   :  { %250 = vmatmul.bf16.vlgmr.msra.gmra.mxu0 %v101_v26 }
  0x30   :  { %270 = vmatmul.bf16.vlgmr.msra.gmra.mxu2 %v109_v27  ;;  %460 = vmatmul.msk.bf16.gmra.mxu1 %vm217_vm0, %v104_v28 }
  0x31   :  { %465 = vmatmul.msk.bf16.gmra.mxu3 %vm217_vm0, %v114_v29 }
  0x3f   :  { %255 = vmatmul.bf16.gmra.mxu0 %v103_v38 }
  0x40   :  { %275 = vmatmul.bf16.gmra.mxu2 %v111_v39  ;;  %461 = vmatmul.msk.bf16.gmra.mxu1 %vm217_vm0, %v106_v40  ;;  %v374_v39 = vld [vmem:[%s722_s3] sm:$0x1]  ;;  %s615_s3 = smov [#allocation8]  }
  0x41   :  { %466 = vmatmul.msk.bf16.gmra.mxu3 %vm217_vm0, %v116_v41  ;;  %375 = vst [vmem:[#allocation8] sm:$0x1] %v374_v39  ;;  %s395_s14 = sshll.u32 %s615_s3, 4  ;;  %s396_s14 = int_to_ptr.vmem [resolvable:$true] %s395_s14 }
  0x42   :  { %376 = vst [vmem:[#allocation8 + $0x18] sm:$0x1] %v374_v39 }
  0x43   :  { %377 = vst [vmem:[#allocation8 + $0x30] sm:$0x1] %v374_v39 }
  0x44   :  { %378 = vst [vmem:[#allocation8 + $0x48] sm:$0x1] %v374_v39 }
  0x45   :  { %379 = vst [vmem:[#allocation8 + $0x60] sm:$0x1] %v374_v39 }
  0x46   :  { %380 = vst [vmem:[#allocation8 + $0x78] sm:$0x1] %v374_v39 }
  0x47   :  { %381 = vst [vmem:[#allocation8 + $0x90] sm:$0x1] %v374_v39 }
  0x48   :  { %382 = vst [vmem:[#allocation8 + $0xa8] sm:$0x1] %v374_v39 }
  0x4f   :  { %260 = vmatmul.bf16.gmra.mxu0 %v105_v48 }
  0x50   :  { %280 = vmatmul.bf16.gmra.mxu2 %v113_v49  ;;  %462 = vmatmul.msk.bf16.gmra.mxu1 %vm217_vm0, %v108_v50 }
  0x5f   :  { %265 = vmatmul.bf16.gmra.mxu0 %v107_v57 }
  0x60   :  { %285 = vmatmul.bf16.gmra.mxu2 %v115_v58  ;;  %463 = vmatmul.msk.bf16.gmra.mxu1 %vm217_vm0, %v110_v59  ;;  %v614_v58 = vmov 0.0  }
  0x61   :  { %383 = vst [vmem:[#allocation8 + $0x11] sm:$0x7f] %v614_v58 }
  0x62   :  { %384 = vst [vmem:[#allocation8 + $0x29] sm:$0x7f] %v614_v58 }
  0x63   :  { %385 = vst [vmem:[#allocation8 + $0x41] sm:$0x7f] %v614_v58 }
  0x64   :  { %386 = vst [vmem:[#allocation8 + $0x59] sm:$0x7f] %v614_v58 }
  0x65   :  { %387 = vst [vmem:[#allocation8 + $0x71] sm:$0x7f] %v614_v58 }
  0x66   :  { %388 = vst [vmem:[#allocation8 + $0x89] sm:$0x7f] %v614_v58 }
  0x67   :  { %389 = vst [vmem:[#allocation8 + $0xa1] sm:$0x7f] %v614_v58 }
  0x68   :  { %390 = vst [vmem:[#allocation8 + $0xb9] sm:$0x7f] %v614_v58 }
  0x9d   :  { %v300_v60 = vpop.f32.mrf.mxu1 }
  0xa4   :  { %v325_v13 = vpop.f32.mrf.mxu3 }
  0xa5   :  { %v302_v61 = vpop.f32.mrf.mxu1 }
  0xac   :  { %v251_v63 = vpop.f32.mrf.mxu0  ;;  %v327_v24 = vpop.f32.mrf.mxu3 }
  0xad   :  { %v252_v0 = vadd.f32 %v669_v62, %v251_v63  ;;  %v305_v1 = vpop.f32.mrf.mxu1 }
  0xaf   :  { %v301_v3 = vadd.f32 %v300_v60, %v252_v0 }
  0xb1   :  { %v342_v4 = vadd.f32 %v672_v2, %v301_v3 }
  0xb3   :  { %358 = vst [vmem:[#allocation8 + $0x1] sm:$0xff] %v342_v4  ;;  %v271_v5 = vpop.f32.mrf.mxu2 }
  0xb4   :  { %v253_v6 = vpop.f32.mrf.mxu0  ;;  %v330_v36 = vpop.f32.mrf.mxu3  ;;  %v272_v51 = vadd.f32 %v669_v62, %v271_v5 }
  0xb5   :  { %v254_v7 = vadd.f32 %v669_v62, %v253_v6  ;;  %v307_v8 = vpop.f32.mrf.mxu1 }
  0xb7   :  { %v303_v10 = vadd.f32 %v302_v61, %v254_v7 }
  0xb9   :  { %v343_v11 = vadd.f32 %v676_v9, %v303_v10 }
  0xbb   :  { %359 = vst [vmem:[#allocation8 + $0x9] sm:$0xff] %v343_v11  ;;  %v679_v12 = vpop.f32.mrf.mxu2 }
  0xbc   :  { %v256_v14 = vpop.f32.mrf.mxu0  ;;  %v332_v49 = vpop.f32.mrf.mxu3  ;;  %v274_v3 = vadd.f32 %v669_v62, %v679_v12 }
  0xbd   :  { %v257_v15 = vadd.f32 %v669_v62, %v256_v14  ;;  %v310_v16 = vpop.f32.mrf.mxu1 }
  0xbf   :  { %v306_v17 = vadd.f32 %v305_v1, %v257_v15 }
  0xc1   :  { %v344_v18 = vadd.f32 %v672_v2, %v306_v17 }
  0xc3   :  { %360 = vst [vmem:[#allocation8 + $0x19] sm:$0xff] %v344_v18  ;;  %v276_v19 = vpop.f32.mrf.mxu2 }
  0xc4   :  { %v277_v20 = vadd.f32 %v669_v62, %v276_v19  ;;  %v258_v21 = vpop.f32.mrf.mxu0  ;;  %v335_v0 = vpop.f32.mrf.mxu3 }
  0xc5   :  { %v259_v22 = vadd.f32 %v669_v62, %v258_v21  ;;  %v312_v23 = vpop.f32.mrf.mxu1 }
  0xc6   :  { %v326_v25 = vadd.f32 %v325_v13, %v277_v20 }
  0xc7   :  { %v308_v26 = vadd.f32 %v307_v8, %v259_v22 }
  0xc8   :  { %v352_v27 = vadd.f32 %v672_v2, %v326_v25 }
  0xc9   :  { %v345_v28 = vadd.f32 %v676_v9, %v308_v26 }
  0xca   :  { %368 = vst [vmem:[#allocation8 + $0x79] sm:$0xff] %v352_v27 }
  0xcb   :  { %361 = vst [vmem:[#allocation8 + $0x21] sm:$0xff] %v345_v28  ;;  %v278_v29 = vpop.f32.mrf.mxu2 }
  0xcc   :  { %v279_v30 = vadd.f32 %v669_v62, %v278_v29  ;;  %v261_v31 = vpop.f32.mrf.mxu0  ;;  %v337_v17 = vpop.f32.mrf.mxu3 }
  0xcd   :  { %v262_v32 = vadd.f32 %v669_v62, %v261_v31  ;;  %v315_v33 = vpop.f32.mrf.mxu1 }
  0xce   :  { %v328_v34 = vadd.f32 %v327_v24, %v279_v30 }
  0xcf   :  { %v311_v35 = vadd.f32 %v310_v16, %v262_v32 }
  0xd0   :  { %v353_v37 = vadd.f32 %v676_v9, %v328_v34 }
  0xd1   :  { %v346_v38 = vadd.f32 %v672_v2, %v311_v35 }
  0xd2   :  { %369 = vst [vmem:[#allocation8 + $0x81] sm:$0xff] %v353_v37 }
  0xd3   :  { %362 = vst [vmem:[#allocation8 + $0x31] sm:$0xff] %v346_v38  ;;  %v281_v40 = vpop.f32.mrf.mxu2 }
  0xd4   :  { %v282_v41 = vadd.f32 %v669_v62, %v281_v40  ;;  %v263_v42 = vpop.f32.mrf.mxu0 }
  0xd5   :  { %v264_v43 = vadd.f32 %v669_v62, %v263_v42  ;;  %v317_v44 = vpop.f32.mrf.mxu1 }
  0xd6   :  { %v331_v45 = vadd.f32 %v330_v36, %v282_v41 }
  0xd7   :  { %v313_v46 = vadd.f32 %v312_v23, %v264_v43 }
  0xd8   :  { %v354_v47 = vadd.f32 %v672_v2, %v331_v45 }
  0xd9   :  { %v347_v48 = vadd.f32 %v676_v9, %v313_v46 }
  0xda   :  { %370 = vst [vmem:[#allocation8 + $0x91] sm:$0xff] %v354_v47 }
  0xdb   :  { %363 = vst [vmem:[#allocation8 + $0x39] sm:$0xff] %v347_v48  ;;  %v283_v50 = vpop.f32.mrf.mxu2 }
  0xdc   :  { %v284_v52 = vadd.f32 %v669_v62, %v283_v50  ;;  %v266_v53 = vpop.f32.mrf.mxu0 }
  0xdd   :  { %v267_v54 = vadd.f32 %v669_v62, %v266_v53  ;;  %v320_v55 = vpop.f32.mrf.mxu1 }
  0xde   :  { %v333_v56 = vadd.f32 %v332_v49, %v284_v52  ;;  %v321_v57 = vadd.f32 %v320_v55, %v272_v51 }
  0xdf   :  { %v316_v59 = vadd.f32 %v315_v33, %v267_v54 }
  0xe0   :  { %v355_v60 = vadd.f32 %v676_v9, %v333_v56  ;;  %v350_v61 = vadd.f32 %v672_v2, %v321_v57 }
  0xe1   :  { %v348_v63 = vadd.f32 %v672_v2, %v316_v59 }
  0xe2   :  { %371 = vst [vmem:[#allocation8 + $0x99] sm:$0xff] %v355_v60 }
  0xe3   :  { %364 = vst [vmem:[#allocation8 + $0x49] sm:$0xff] %v348_v63  ;;  %v286_v1 = vpop.f32.mrf.mxu2 }
  0xe4   :  { %366 = vst [vmem:[#allocation8 + $0x61] sm:$0xff] %v350_v61  ;;  %v287_v4 = vadd.f32 %v669_v62, %v286_v1  ;;  %v268_v5 = vpop.f32.mrf.mxu0 }
  0xe5   :  { %v269_v6 = vadd.f32 %v669_v62, %v268_v5  ;;  %v322_v7 = vpop.f32.mrf.mxu1 }
  0xe6   :  { %v336_v8 = vadd.f32 %v335_v0, %v287_v4  ;;  %v323_v10 = vadd.f32 %v322_v7, %v274_v3 }
  0xe7   :  { %v318_v11 = vadd.f32 %v317_v44, %v269_v6 }
  0xe8   :  { %v356_v13 = vadd.f32 %v672_v2, %v336_v8  ;;  %v351_v14 = vadd.f32 %v676_v9, %v323_v10 }
  0xe9   :  { %v349_v12 = vadd.f32 %v676_v9, %v318_v11 }
  0xea   :  { %372 = vst [vmem:[#allocation8 + $0xa9] sm:$0xff] %v356_v13 }
  0xeb   :  { %365 = vst [vmem:[#allocation8 + $0x51] sm:$0xff] %v349_v12  ;;  %v288_v15 = vpop.f32.mrf.mxu2 }
  0xec   :  { %367 = vst [vmem:[#allocation8 + $0x69] sm:$0xff] %v351_v14  ;;  %v289_v16 = vadd.f32 %v669_v62, %v288_v15 }
  0xee   :  { %v338_v18 = vadd.f32 %v337_v17, %v289_v16 }
  0xf0   :  { %v357_v2 = vadd.f32 %v676_v9, %v338_v18 }
  0xf2   :  { %373 = vst [vmem:[#allocation8 + $0xb1] sm:$0xff] %v357_v2 }
  0xf3   :  { %403 = dma.vmem_to_hbm [thread:$0]  %s396_s14, 3072, %s398_s17, [#allocation4], %s612_s11, %s612_s11, %s613_s0  }
  0xf4   :  { %603 = dma.done.wait [#allocation4], 3072  }
  0xf5   :  { %604 = vsyncadd [#allocation4], 4294964224 }
  0xf6   :  { %408 = vsyncpa [#allocation3], 1 }
  0xf7   :  { %409 = vsyncpa [#allocation6], 1 }
  0xf8   :  { %410 = vsyncpa [#allocation4], 1 }

</bundles_post_ra>
